<compile_context>
chip_gen: v7x
topology: tpu7x:2x2x1
jax: 0.10.0
libtpu: 0.0.40
codegen_flags: <defaults>
</compile_context>

<pallas_src>
from functools import partial

import numpy as np
import jax
import jax.numpy as jnp
from jax import lax
from jax.experimental import pallas as pl
from jax.experimental.pallas import tpu as pltpu


NEG_PAD = -1e30  # pad value for Bk rows/cols: exp underflows to 0 -> exact lse


def _round_up(x, m):
    return (x + m - 1) // m * m


def _pick_tile_n(n_rows_pad, n_cols_pad, budget_bytes=8 * 1024 * 1024):
    # ~10 live (n_rows_pad, TILE_N) f32 buffers (double-buffered I/O + temporaries).
    t = budget_bytes // (10 * n_rows_pad * 4)
    t = max(128, (t // 128) * 128)
    return min(n_cols_pad, t)


def _compiler_params(n_rows_pad, tile_n, n_bufs=10):
    est = n_bufs * n_rows_pad * tile_n * 4
    vmem = None
    if est > 12 * 1024 * 1024:  # only raise the scoped limit when we actually need it
        vmem = min(int(est * 2), 64 * 1024 * 1024)
    return pltpu.CompilerParams(
        dimension_semantics=("parallel",), vmem_limit_bytes=vmem
    )


# ----------------------- kernel 1: sampling scores (log-softmax + gumbel) -----------
def _score_kernel(bk_ref, g_ref, scores_ref):
    bk = bk_ref[...]                                           # (R, T) f32
    m = jnp.max(bk, axis=0, keepdims=True)                     # (1, T)
    lse = m + jnp.log(jnp.sum(jnp.exp(bk - m), axis=0, keepdims=True))
    # exact log-softmax over rows (dim=0) + gumbel noise; softmax P never materialized
    scores_ref[...] = bk - lse + g_ref[...]


def compute_scores(bk_pad, g_pad, tile_n):
    R, Cp = bk_pad.shape
    return pl.pallas_call(
        _score_kernel,
        out_shape=jax.ShapeDtypeStruct((R, Cp), jnp.float32),
        grid=(Cp // tile_n,),
        in_specs=[pl.BlockSpec((R, tile_n), lambda i: (0, i)),
                  pl.BlockSpec((R, tile_n), lambda i: (0, i))],
        out_specs=pl.BlockSpec((R, tile_n), lambda i: (0, i)),
        compiler_params=_compiler_params(R, tile_n, n_bufs=8),
    )(bk_pad, g_pad)


# --------------------- kernel 2: edge flip + fused lse + per-column log_p -----------
def _edit_kernel(n_true, num_sample, bk_ref, a_ref, s_ref, c_ref, logp_ref):
    R, T = a_ref.shape
    a = a_ref[...]                                             # dense adjacency (0/1)
    bk = bk_ref[...]
    s = s_ref[...]                                             # (ns_pad, T) int32

    row_ids = lax.broadcasted_iota(jnp.int32, (R, T), 0)       # row index r at [r, c]
    # boolean flip mask: M[r, c] = any_j (S_t[j, c] == r)
    # num_sample is small; static unroll is fine (switch to lax.fori_loop if it grows).
    mask = row_ids == s[0:1, :]
    for j in range(1, num_sample):
        mask = jnp.logical_or(mask, row_ids == s[j:j + 1, :])

    # C = A + M * ((1 - A) - A)  ==  where(M, 1 - A, A)
    c_ref[...] = jnp.where(mask, 1.0 - a, a)

    # column logsumexp recomputed here (Bk already resident; never round-trips HBM)
    m = jnp.max(bk, axis=0, keepdims=True)
    lse = m + jnp.log(jnp.sum(jnp.exp(bk - m), axis=0, keepdims=True))
    sel = jnp.sum(jnp.where(mask, bk, 0.0), axis=0, keepdims=True)

    col = pl.program_id(0) * T + lax.broadcasted_iota(jnp.int32, (1, T), 1)
    logp_ref[...] = jnp.where(col < n_true, sel - lse, 0.0)


def graph_edit(bk_pad, a_pad, s_t, num_sample, n_true, tile_n):
    R, Cp = a_pad.shape
    ns_pad = s_t.shape[0]
    kernel = partial(_edit_kernel, n_true, num_sample)
    return pl.pallas_call(
        kernel,
        out_shape=(jax.ShapeDtypeStruct((R, Cp), jnp.float32),
                   jax.ShapeDtypeStruct((1, Cp), jnp.float32)),
        grid=(Cp // tile_n,),
        in_specs=[pl.BlockSpec((R, tile_n), lambda i: (0, i)),
                  pl.BlockSpec((R, tile_n), lambda i: (0, i)),
                  pl.BlockSpec((ns_pad, tile_n), lambda i: (0, i))],
        out_specs=(pl.BlockSpec((R, tile_n), lambda i: (0, i)),
                   pl.BlockSpec((1, tile_n), lambda i: (0, i))),
        compiler_params=_compiler_params(R, tile_n, n_bufs=10),
    )(bk_pad, a_pad, s_t)


# ------------------------------------ wrapper ---------------------------------------
@partial(jax.jit, static_argnums=(2, 3))
def graph_editer_forward(B, edge_index, num_sample, k, sample_key):
    """Returns (C_dense (n,n), log_p scalar, S (n, num_sample))."""
    K, n, _ = B.shape
    Bk = B[k].astype(jnp.float32)

    # pad rows to sublane multiple (8) and columns to lane multiple (128)
    R = _round_up(n, 8)
    Cp = _round_up(n, 128)
    tile_n = _pick_tile_n(R, Cp)
    # NOTE: this column-tiled design keeps full columns in VMEM; for very large n a
    # 2-D (row x column) tiling with cross-tile lse/mask reduction would be required.

    Bk_pad = jnp.full((R, Cp), NEG_PAD, jnp.float32).at[:n, :n].set(Bk)

    # to_dense_adj(edge_index, max_num_nodes=n)  (glue scatter)
    src, dst = edge_index[0], edge_index[1]
    A_pad = jnp.zeros((R, Cp), jnp.float32).at[src, dst].set(1.0)

    # torch.multinomial(P, num_sample) without replacement (per row of P) via
    # Gumbel top-k on exact log-softmax scores (kernel 1 computes Bk - lse + gumbel).
    u = jax.random.uniform(sample_key, (R, Cp), minval=1e-20, maxval=1.0)
    gumbel = -jnp.log(-jnp.log(u))
    scores = compute_scores(Bk_pad, gumbel, tile_n)
    S = lax.top_k(scores[:n, :n], num_sample)[1].astype(jnp.int32)  # (n, num_sample)

    # transpose + pad samples: S_t[j, c] = row index to flip in column c (-1 = none)
    ns_pad = _round_up(num_sample, 8)
    S_t = jnp.full((ns_pad, Cp), -1, jnp.int32).at[:num_sample, :n].set(S.T)

    # mask scatter, edge flip, per-column log_p partials (kernel 2)
    C_pad, logp_col = graph_edit(Bk_pad, A_pad, S_t, num_sample, n, tile_n)
    C = C_pad[:n, :n]
    log_p = jnp.sum(logp_col)
    return C, log_p, S


# ------------------------------------- main ------------------------------------------
if __name__ == "__main__":
    K, n, num_sample, k = 3, 64, 4, 1
    num_edges = 128

    root = jax.random.PRNGKey(0)
    kB, kS, kD, kSamp = jax.random.split(root, 4)

    # nn.init.uniform_ on B of shape (K, n, n)
    B = jax.random.uniform(kB, (K, n, n), dtype=jnp.float32)

    # deterministic synthetic edge_index (2, num_edges)
    src = jax.random.randint(kS, (num_edges,), 0, n, dtype=jnp.int32)
    dst = jax.random.randint(kD, (num_edges,), 0, n, dtype=jnp.int32)
    edge_index = jnp.stack([src, dst], axis=0)

    C, log_p, S = graph_editer_forward(B, edge_index, num_sample, k, kSamp)
    jax.block_until_ready((C, log_p, S))

    # dense_to_sparse(C)[0]: dynamic output size -> extracted on host.
    # TODO(synk): dense_to_sparse has no fixed-shape Pallas equivalent; done host-side.
    C_np = np.asarray(C)
    new_edge_index = np.stack(np.nonzero(C_np), axis=0)

    # ------------------ pure-numpy reference check (same samples S) ------------------
    Bk_np = np.asarray(B[k])
    S_np = np.asarray(S)
    A_np = np.zeros((n, n), dtype=np.float32)
    A_np[np.asarray(src), np.asarray(dst)] = 1.0
    col_idx = np.tile(np.arange(n)[:, None], (1, num_sample))
    M_np = np.zeros((n, n), dtype=np.float32)
    M_np[S_np, col_idx] = 1.0
    C_ref = A_np + M_np * ((1.0 - A_np) - A_np)
    mx = Bk_np.max(axis=0)
    lse_ref = mx + np.log(np.exp(Bk_np - mx).sum(axis=0))
    logp_ref = (Bk_np[S_np, col_idx].sum(axis=1) - lse_ref).sum()

    assert np.allclose(C_np, C_ref, atol=1e-5), "edited adjacency mismatch"
    assert np.allclose(float(log_p), logp_ref, rtol=1e-4, atol=1e-3), "log_p mismatch"
    assert new_edge_index.shape[0] == 2
    assert S_np.shape == (n, num_sample) and S_np.min() >= 0 and S_np.max() < n

    print("KERNEL_OK")
</pallas_src>

<mosaic_0001>
module attributes {stable_mosaic.version = 11 : i64} {
  func.func @_score_kernel(%arg0: i32, %arg1: memref<64x128xf32, #tpu.memory_space<vmem>>, %arg2: memref<64x128xf32, #tpu.memory_space<vmem>>, %arg3: memref<64x128xf32, #tpu.memory_space<vmem>>) attributes {dimension_semantics = [#tpu.dimension_semantics<parallel>], iteration_bounds = array<i64: 1>, scalar_prefetch = 0 : i64, scratch_operands = 0 : i64, tpu.core_type = #tpu.core_type<tc>, window_params = [{transform_indices = @transform_0, window_bounds = array<i64: 64, 128>}, {transform_indices = @transform_1, window_bounds = array<i64: 64, 128>}, {transform_indices = @transform_2, window_bounds = array<i64: 64, 128>}]} {
    %c0 = arith.constant 0 : index
    %c0_0 = arith.constant 0 : index
    %0 = vector.load %arg1[%c0, %c0_0] : memref<64x128xf32, #tpu.memory_space<vmem>>, vector<64x128xf32>
    %cst = arith.constant dense<0xFF800000> : vector<128xf32>
    %1 = vector.multi_reduction <maximumf>, %0, %cst [0] : vector<64x128xf32> to vector<128xf32>
    %2 = vector.shape_cast %1 : vector<128xf32> to vector<1x128xf32>
    %3 = vector.broadcast %2 : vector<1x128xf32> to vector<64x128xf32>
    %4 = arith.subf %0, %3 : vector<64x128xf32>
    %5 = math.exp %4 : vector<64x128xf32>
    %cst_1 = arith.constant dense<0.000000e+00> : vector<128xf32>
    %6 = vector.multi_reduction <add>, %5, %cst_1 [0] : vector<64x128xf32> to vector<128xf32>
    %7 = vector.shape_cast %6 : vector<128xf32> to vector<1x128xf32>
    %8 = math.log %7 : vector<1x128xf32>
    %9 = arith.addf %2, %8 : vector<1x128xf32>
    %10 = vector.broadcast %9 : vector<1x128xf32> to vector<64x128xf32>
    %11 = arith.subf %0, %10 : vector<64x128xf32>
    %c0_2 = arith.constant 0 : index
    %c0_3 = arith.constant 0 : index
    %12 = vector.load %arg2[%c0_2, %c0_3] : memref<64x128xf32, #tpu.memory_space<vmem>>, vector<64x128xf32>
    %13 = arith.addf %11, %12 : vector<64x128xf32>
    %c0_4 = arith.constant 0 : index
    %c0_5 = arith.constant 0 : index
    %14 = vector.load %arg3[%c0_4, %c0_5] : memref<64x128xf32, #tpu.memory_space<vmem>>, vector<64x128xf32>
    tpu.vector_store %arg3[%c0_4, %c0_5], %13 {strides = array<i32>} : memref<64x128xf32, #tpu.memory_space<vmem>>, vector<64x128xf32>,
    return
  }
  func.func @transform_0(%arg0: i32) -> (i32, i32) {
    %c0_i32 = arith.constant 0 : i32
    %c0_i32_0 = arith.constant 0 : i32
    return %c0_i32, %arg0 : i32, i32
  }
  func.func @transform_1(%arg0: i32) -> (i32, i32) {
    %c0_i32 = arith.constant 0 : i32
    %c0_i32_0 = arith.constant 0 : i32
    return %c0_i32, %arg0 : i32, i32
  }
  func.func @transform_2(%arg0: i32) -> (i32, i32) {
    %c0_i32 = arith.constant 0 : i32
    %c0_i32_0 = arith.constant 0 : i32
    return %c0_i32, %arg0 : i32, i32
  }
}

module attributes {stable_mosaic.version = 11 : i64} {
  func.func @_edit_kernel(%arg0: i32, %arg1: memref<64x128xf32, #tpu.memory_space<vmem>>, %arg2: memref<64x128xf32, #tpu.memory_space<vmem>>, %arg3: memref<8x128xi32, #tpu.memory_space<vmem>>, %arg4: memref<64x128xf32, #tpu.memory_space<vmem>>, %arg5: memref<1x128xf32, #tpu.memory_space<vmem>>) attributes {dimension_semantics = [#tpu.dimension_semantics<parallel>], iteration_bounds = array<i64: 1>, scalar_prefetch = 0 : i64, scratch_operands = 0 : i64, tpu.core_type = #tpu.core_type<tc>, window_params = [{transform_indices = @transform_0, window_bounds = array<i64: 64, 128>}, {transform_indices = @transform_1, window_bounds = array<i64: 64, 128>}, {transform_indices = @transform_2, window_bounds = array<i64: 8, 128>}, {transform_indices = @transform_3, window_bounds = array<i64: 64, 128>}, {transform_indices = @transform_4, window_bounds = array<i64: 1, 128>}]} {
    %c0 = arith.constant 0 : index
    %c0_0 = arith.constant 0 : index
    %0 = vector.load %arg2[%c0, %c0_0] : memref<64x128xf32, #tpu.memory_space<vmem>>, vector<64x128xf32>
    %c0_1 = arith.constant 0 : index
    %c0_2 = arith.constant 0 : index
    %1 = vector.load %arg1[%c0_1, %c0_2] : memref<64x128xf32, #tpu.memory_space<vmem>>, vector<64x128xf32>
    %c0_3 = arith.constant 0 : index
    %c0_4 = arith.constant 0 : index
    %2 = vector.load %arg3[%c0_3, %c0_4] : memref<8x128xi32, #tpu.memory_space<vmem>>, vector<8x128xi32>
    %3 = tpu.iota {dimensions = array<i32: 0>} : vector<64x128xi32>
    %4 = vector.extract_strided_slice %2 {offsets = [0, 0], sizes = [1, 128], strides = [1, 1]} : vector<8x128xi32> to vector<1x128xi32>
    %5 = vector.broadcast %4 : vector<1x128xi32> to vector<64x128xi32>
    %6 = arith.cmpi eq, %3, %5 : vector<64x128xi32>
    %7 = vector.extract_strided_slice %2 {offsets = [1, 0], sizes = [1, 128], strides = [1, 1]} : vector<8x128xi32> to vector<1x128xi32>
    %8 = vector.broadcast %7 : vector<1x128xi32> to vector<64x128xi32>
    %9 = arith.cmpi eq, %3, %8 : vector<64x128xi32>
    %10 = arith.ori %6, %9 : vector<64x128xi1>
    %11 = vector.extract_strided_slice %2 {offsets = [2, 0], sizes = [1, 128], strides = [1, 1]} : vector<8x128xi32> to vector<1x128xi32>
    %12 = vector.broadcast %11 : vector<1x128xi32> to vector<64x128xi32>
    %13 = arith.cmpi eq, %3, %12 : vector<64x128xi32>
    %14 = arith.ori %10, %13 : vector<64x128xi1>
    %15 = vector.extract_strided_slice %2 {offsets = [3, 0], sizes = [1, 128], strides = [1, 1]} : vector<8x128xi32> to vector<1x128xi32>
    %16 = vector.broadcast %15 : vector<1x128xi32> to vector<64x128xi32>
    %17 = arith.cmpi eq, %3, %16 : vector<64x128xi32>
    %18 = arith.ori %14, %17 : vector<64x128xi1>
    %cst = arith.constant 1.000000e+00 : f32
    %19 = vector.broadcast %cst : f32 to vector<64x128xf32>
    %20 = arith.subf %19, %0 : vector<64x128xf32>
    %21 = arith.select %18, %20, %0 : vector<64x128xi1>, vector<64x128xf32>
    %c0_5 = arith.constant 0 : index
    %c0_6 = arith.constant 0 : index
    %22 = vector.load %arg4[%c0_5, %c0_6] : memref<64x128xf32, #tpu.memory_space<vmem>>, vector<64x128xf32>
    tpu.vector_store %arg4[%c0_5, %c0_6], %21 {strides = array<i32>} : memref<64x128xf32, #tpu.memory_space<vmem>>, vector<64x128xf32>,
    %cst_7 = arith.constant dense<0xFF800000> : vector<128xf32>
    %23 = vector.multi_reduction <maximumf>, %1, %cst_7 [0] : vector<64x128xf32> to vector<128xf32>
    %24 = vector.shape_cast %23 : vector<128xf32> to vector<1x128xf32>
    %25 = vector.broadcast %24 : vector<1x128xf32> to vector<64x128xf32>
    %26 = arith.subf %1, %25 : vector<64x128xf32>
    %27 = math.exp %26 : vector<64x128xf32>
    %cst_8 = arith.constant dense<0.000000e+00> : vector<128xf32>
    %28 = vector.multi_reduction <add>, %27, %cst_8 [0] : vector<64x128xf32> to vector<128xf32>
    %29 = vector.shape_cast %28 : vector<128xf32> to vector<1x128xf32>
    %30 = math.log %29 : vector<1x128xf32>
    %31 = arith.addf %24, %30 : vector<1x128xf32>
    %cst_9 = arith.constant 0.000000e+00 : f32
    %32 = vector.broadcast %cst_9 : f32 to vector<64x128xf32>
    %33 = arith.select %18, %1, %32 : vector<64x128xi1>, vector<64x128xf32>
    %cst_10 = arith.constant dense<0.000000e+00> : vector<128xf32>
    %34 = vector.multi_reduction <add>, %33, %cst_10 [0] : vector<64x128xf32> to vector<128xf32>
    %35 = vector.shape_cast %34 : vector<128xf32> to vector<1x128xf32>
    %c128_i32 = arith.constant 128 : i32
    %36 = arith.muli %arg0, %c128_i32 : i32
    %37 = tpu.iota {dimensions = array<i32: 1>} : vector<1x128xi32>
    %38 = vector.broadcast %36 : i32 to vector<1x128xi32>
    %39 = arith.addi %38, %37 : vector<1x128xi32>
    %c64_i32 = arith.constant 64 : i32
    %40 = vector.broadcast %c64_i32 : i32 to vector<1x128xi32>
    %41 = arith.cmpi slt, %39, %40 : vector<1x128xi32>
    %42 = arith.subf %35, %31 : vector<1x128xf32>
    %cst_11 = arith.constant 0.000000e+00 : f32
    %43 = vector.broadcast %cst_11 : f32 to vector<1x128xf32>
    %44 = arith.select %41, %42, %43 : vector<1x128xi1>, vector<1x128xf32>
    %c0_12 = arith.constant 0 : index
    %c0_13 = arith.constant 0 : index
    %45 = vector.load %arg5[%c0_12, %c0_13] : memref<1x128xf32, #tpu.memory_space<vmem>>, vector<1x128xf32>
    tpu.vector_store %arg5[%c0_12, %c0_13], %44 {strides = array<i32>} : memref<1x128xf32, #tpu.memory_space<vmem>>, vector<1x128xf32>,
    return
  }
  func.func @transform_0(%arg0: i32) -> (i32, i32) {
    %c0_i32 = arith.constant 0 : i32
    %c0_i32_0 = arith.constant 0 : i32
    return %c0_i32, %arg0 : i32, i32
  }
  func.func @transform_1(%arg0: i32) -> (i32, i32) {
    %c0_i32 = arith.constant 0 : i32
    %c0_i32_0 = arith.constant 0 : i32
    return %c0_i32, %arg0 : i32, i32
  }
  func.func @transform_2(%arg0: i32) -> (i32, i32) {
    %c0_i32 = arith.constant 0 : i32
    %c0_i32_0 = arith.constant 0 : i32
    return %c0_i32, %arg0 : i32, i32
  }
  func.func @transform_3(%arg0: i32) -> (i32, i32) {
    %c0_i32 = arith.constant 0 : i32
    %c0_i32_0 = arith.constant 0 : i32
    return %c0_i32, %arg0 : i32, i32
  }
  func.func @transform_4(%arg0: i32) -> (i32, i32) {
    %c0_i32 = arith.constant 0 : i32
    %c0_i32_0 = arith.constant 0 : i32
    return %c0_i32, %arg0 : i32, i32
  }
}

</mosaic_0001>

<bundles_post_ra>
// kernel: graph_editer_forward.2
= control target key start
LH: loop header
LB: loop body
LE: loop exit
PB: predicated region body
PF: predicated region fallthrough
CT: control target
= control target key end

     0   :  { %s253_s0 = inlined_call_operand.vmem [shape: f32[64,128], index: 0, kind: input, shape index: {}]   ;;  %s254_s1 = inlined_call_operand.vmem [shape: f32[64,128], index: 1, kind: input, shape index: {}]   ;;  %s255_s2 = inlined_call_operand.vmem [shape: f32[64,128], index: 2, kind: output, shape index: {}]  }
   0x1   :  { %v144_v0 = vld [vmem:[%s253_s0] sm:$0xff]  ;;  %v149_v1 = vld [vmem:[%s253_s0 + $0x8] sm:$0xff]  ;;  %v154_v2 = vld [vmem:[%s253_s0 + $0x10] sm:$0xff] }
   0x2   :  { %v159_v3 = vld [vmem:[%s253_s0 + $0x18] sm:$0xff]  ;;  %v164_v4 = vld [vmem:[%s253_s0 + $0x20] sm:$0xff]  ;;  %v169_v5 = vld [vmem:[%s253_s0 + $0x28] sm:$0xff] }
   0x3   :  { %v174_v6 = vld [vmem:[%s253_s0 + $0x30] sm:$0xff]  ;;  %v179_v7 = vld [vmem:[%s253_s0 + $0x38] sm:$0xff]  ;;  %v19_v8 = vmax.f32 %v144_v0, %v164_v4  ;;  %v20_v9 = vmax.f32 %v149_v1, %v169_v5  ;;  %v80_v61 = vld [vmem:[%s254_s1] sm:$0xff] }
   0x4   :  { %v21_v10 = vmax.f32 %v154_v2, %v174_v6  ;;  %v22_v11 = vmax.f32 %v159_v3, %v179_v7  ;;  %v81_v62 = vld [vmem:[%s254_s1 + $0x8] sm:$0xff]  ;;  %v82_v63 = vld [vmem:[%s254_s1 + $0x10] sm:$0xff] }
   0x5   :  { %v23_v12 = vmax.f32 %v19_v8, %v20_v9  ;;  %v83_v8 = vld [vmem:[%s254_s1 + $0x18] sm:$0xff]  ;;  %v84_v9 = vld [vmem:[%s254_s1 + $0x20] sm:$0xff] }
   0x6   :  { %v24_v13 = vmax.f32 %v21_v10, %v22_v11 }
   0x8   :  { %v25_v14 = vmax.f32 %v23_v12, %v24_v13 }
   0xa   :  { %v26_v15 = vrot.slane %v25_v14, 4 }
   0xc   :  { %v27_v16 = vmax.f32 %v25_v14, %v26_v15  ;;  %v85_v14 = vld [vmem:[%s254_s1 + $0x28] sm:$0xff]  ;;  %v86_v15 = vld [vmem:[%s254_s1 + $0x30] sm:$0xff] }
   0xe   :  { %v28_v17 = vrot.slane %v27_v16, 2 }
  0x10   :  { %v29_v18 = vmax.f32 %v27_v16, %v28_v17  ;;  %v87_v16 = vld [vmem:[%s254_s1 + $0x38] sm:$0xff] }
  0x12   :  { %v30_v19 = vrot.slane %v29_v18, 1 }
  0x14   :  { %v31_v20 = vmax.f32 %v29_v18, %v30_v19 }
  0x16   :  { %v32_v21 = vsub.f32 %v144_v0, %v31_v20  ;;  %v33_v22 = vsub.f32 %v149_v1, %v31_v20  ;;  %v34_v23 = vsub.f32 %v154_v2, %v31_v20  ;;  %v35_v24 = vsub.f32 %v159_v3, %v31_v20 }
  0x17   :  { %v36_v25 = vsub.f32 %v164_v4, %v31_v20  ;;  %v37_v29 = vsub.f32 %v169_v5, %v31_v20  ;;  %v38_v31 = vsub.f32 %v174_v6, %v31_v20  ;;  %v39_v33 = vsub.f32 %v179_v7, %v31_v20 }
  0x18   :  { %v40_v26 = vmul.f32 1.442695, %v32_v21  ;;  %v42_v27 = vmul.f32 1.442695, %v33_v22  ;;  %v44_v28 = vmul.f32 1.442695, %v34_v23 }
  0x19   :  { %v46_v30 = vmul.f32 1.442695, %v35_v24  ;;  %v48_v32 = vmul.f32 1.442695, %v36_v25  ;;  %v50_v34 = vmul.f32 1.442695, %v37_v29 }
  0x1a   :  { %108 = vpow2.f32 %v40_v26  ;;  %v52_v35 = vmul.f32 1.442695, %v38_v31  ;;  %v54_v36 = vmul.f32 1.442695, %v39_v33 }
  0x1b   :  { %110 = vpow2.f32 %v42_v27 }
  0x1c   :  { %112 = vpow2.f32 %v44_v28 }
  0x1d   :  { %114 = vpow2.f32 %v46_v30 }
  0x1e   :  { %116 = vpow2.f32 %v48_v32 }
  0x1f   :  { %118 = vpow2.f32 %v50_v34 }
  0x20   :  { %120 = vpow2.f32 %v52_v35 }
  0x21   :  { %122 = vpow2.f32 %v54_v36 }
  0x24   :  { %v109_v37 = vpop.eup %108 }
  0x25   :  { %v111_v38 = vpop.eup %110 }
  0x26   :  { %v113_v39 = vpop.eup %112  ;;  %v56_v40 = vadd.f32 %v111_v38, %v109_v37 }
  0x27   :  { %v115_v41 = vpop.eup %114 }
  0x28   :  { %v57_v42 = vadd.f32 %v113_v39, %v56_v40  ;;  %v117_v43 = vpop.eup %116 }
  0x29   :  { %v119_v45 = vpop.eup %118 }
  0x2a   :  { %v58_v44 = vadd.f32 %v115_v41, %v57_v42  ;;  %v121_v47 = vpop.eup %120 }
  0x2b   :  { %v123_v49 = vpop.eup %122 }
  0x2c   :  { %v59_v46 = vadd.f32 %v117_v43, %v58_v44 }
  0x2e   :  { %v60_v48 = vadd.f32 %v119_v45, %v59_v46 }
  0x30   :  { %v61_v50 = vadd.f32 %v121_v47, %v60_v48 }
  0x32   :  { %v62_v51 = vadd.f32 %v123_v49, %v61_v50 }
  0x34   :  { %v63_v52 = vrot.slane %v62_v51, 4 }
  0x36   :  { %v64_v53 = vadd.f32 %v63_v52, %v62_v51 }
  0x38   :  { %v65_v54 = vrot.slane %v64_v53, 2 }
  0x3a   :  { %v66_v55 = vadd.f32 %v65_v54, %v64_v53 }
  0x3c   :  { %v67_v56 = vrot.slane %v66_v55, 1 }
  0x3e   :  { %v68_v57 = vadd.f32 %v67_v56, %v66_v55 }
  0x40   :  { %124 = vlog2.f32 %v68_v57 }
  0x4a   :  { %v125_v58 = vpop.eup %124 }
  0x4b   :  { %v70_v59 = vmul.f32 0.6931472, %v125_v58 }
  0x4d   :  { %v71_v60 = vadd.f32 %v70_v59, %v31_v20 }
  0x4f   :  { %v72_v10 = vsub.f32 %v144_v0, %v71_v60  ;;  %v73_v11 = vsub.f32 %v149_v1, %v71_v60  ;;  %v74_v12 = vsub.f32 %v154_v2, %v71_v60  ;;  %v75_v13 = vsub.f32 %v159_v3, %v71_v60 }
  0x50   :  { %v76_v0 = vsub.f32 %v164_v4, %v71_v60  ;;  %v77_v1 = vsub.f32 %v169_v5, %v71_v60  ;;  %v78_v2 = vsub.f32 %v174_v6, %v71_v60  ;;  %v79_v3 = vsub.f32 %v179_v7, %v71_v60 }
  0x51   :  { %v88_v17 = vadd.f32 %v80_v61, %v72_v10  ;;  %v89_v18 = vadd.f32 %v81_v62, %v73_v11  ;;  %v90_v19 = vadd.f32 %v82_v63, %v74_v12  ;;  %v91_v20 = vadd.f32 %v83_v8, %v75_v13 }
  0x52   :  { %v92_v21 = vadd.f32 %v84_v9, %v76_v0  ;;  %v93_v22 = vadd.f32 %v85_v14, %v77_v1  ;;  %v94_v23 = vadd.f32 %v86_v15, %v78_v2  ;;  %v95_v24 = vadd.f32 %v87_v16, %v79_v3 }
  0x53   :  { %96 = vst [vmem:[%s255_s2] sm:$0xff] %v88_v17  ;;  %97 = vst [vmem:[%s255_s2 + $0x8] sm:$0xff] %v89_v18 }
  0x54   :  { %98 = vst [vmem:[%s255_s2 + $0x10] sm:$0xff] %v90_v19  ;;  %99 = vst [vmem:[%s255_s2 + $0x18] sm:$0xff] %v91_v20 }
  0x55   :  { %100 = vst [vmem:[%s255_s2 + $0x20] sm:$0xff] %v92_v21  ;;  %101 = vst [vmem:[%s255_s2 + $0x28] sm:$0xff] %v93_v22 }
  0x56   :  { %102 = vst [vmem:[%s255_s2 + $0x30] sm:$0xff] %v94_v23  ;;  %103 = vst [vmem:[%s255_s2 + $0x38] sm:$0xff] %v95_v24 }

// kernel: graph_editer_forward.3
= control target key start
LH: loop header
LB: loop body
LE: loop exit
PB: predicated region body
PF: predicated region fallthrough
CT: control target
= control target key end

     0   :  { %v34_v0 = vlaneseq  ;;  %s565_s0 = inlined_call_operand.vmem [shape: f32[64,128], index: 0, kind: input, shape index: {}]   ;;  %s566_s1 = inlined_call_operand.vmem [shape: f32[64,128], index: 1, kind: input, shape index: {}]   ;;  %s567_s2 = inlined_call_operand.vmem [shape: s32[8,128], index: 2, kind: input, shape index: {}]   ;;  %s568_s3 = inlined_call_operand.hbm [shape: f32[64,128], index: 3, kind: output, shape index: {0}]   ;;  %s569_s4 = inlined_call_operand.vmem [shape: f32[1,128], index: 4, kind: output, shape index: {1}]  }
   0x1   :  { %v33_v2 = vld [vmem:[%s567_s2] sm:$0xff] }
   0x2   :  { %v316_v1 = vshrl.u32 %v34_v0, 7  ;;  %v17_v3 = vld [vmem:[%s566_s1] sm:$0xff] }
   0x4   :  { %v45_v4 = vsub.s32 0, %v316_v1  ;;  %v57_v5 = vsub.s32 1, %v316_v1  ;;  %v77_v6 = vsub.s32 2, %v316_v1  ;;  %v97_v7 = vsub.s32 3, %v316_v1 }
   0x5   :  { %v36_v8 = vadd.s32 8, %v316_v1 }
   0x6   :  { %v329_v9 = vrot.slane %v33_v2, %v45_v4  ;;  %v331_v10 = vrot.slane %v33_v2, %v57_v5  ;;  %v333_v11 = vrot.slane %v33_v2, %v77_v6  ;;  %v335_v12 = vrot.slane %v33_v2, %v97_v7 }
   0x7   :  { %10 = vsyncpa [#allocation3], 0  ;;  %v115_v13 = vsub.f32 1.0, %v17_v3  ;;  %v37_v14 = vadd.s32 16, %v316_v1  ;;  %v18_v15 = vld [vmem:[%s566_s1 + $0x8] sm:$0xff]  ;;  %v352_v16 = vld [vmem:[%s565_s0] sm:$0xff] }
   0x8   :  { %vm47_vm0 = vcmp.eq.s32.totalorder %v316_v1, %v329_v9  ;;  %vm59_vm1 = vcmp.eq.s32.totalorder %v316_v1, %v331_v10  ;;  %vm79_vm2 = vcmp.eq.s32.totalorder %v316_v1, %v333_v11  ;;  %vm99_vm3 = vcmp.eq.s32.totalorder %v316_v1, %v335_v12  ;;  %v359_v17 = vld [vmem:[%s565_s0 + $0x8] sm:$0xff]  ;;  %v19_v18 = vld [vmem:[%s566_s1 + $0x10] sm:$0xff]  ;;  %v374_v22 = vld [vmem:[%s565_s0 + $0x20] sm:$0xff] }
   0x9   :  { %vm67_vm4 = vmor %vm47_vm0, %vm59_vm1  ;;  %vm48_vm5 = vcmp.eq.s32.totalorder %v36_v8, %v329_v9  ;;  %vm60_vm6 = vcmp.eq.s32.totalorder %v36_v8, %v331_v10  ;;  %vm80_vm8 = vcmp.eq.s32.totalorder %v36_v8, %v333_v11  ;;  %vm100_vm10 = vcmp.eq.s32.totalorder %v36_v8, %v335_v12  ;;  %v379_v23 = vld [vmem:[%s565_s0 + $0x28] sm:$0xff]  ;;  %v388_v25 = vld [vmem:[%s565_s0 + $0x10] sm:$0xff] }
   0xa   :  { %vm87_vm7 = vmor %vm67_vm4, %vm79_vm2  ;;  %v116_v20 = vsub.f32 1.0, %v18_v15  ;;  %v38_v21 = vadd.s32 24, %v316_v1  ;;  %vm49_vm12 = vcmp.eq.s32.totalorder %v37_v14, %v329_v9  ;;  %vm61_vm13 = vcmp.eq.s32.totalorder %v37_v14, %v331_v10  ;;  %v395_v27 = vld [vmem:[%s565_s0 + $0x30] sm:$0xff]  ;;  %v20_v30 = vld [vmem:[%s566_s1 + $0x18] sm:$0xff] }
   0xb   :  { %vm365_vm9 = vmor %vm87_vm7, %vm99_vm3  ;;  %vm81_vm15 = vcmp.eq.s32.totalorder %v37_v14, %v333_v11  ;;  %v39_v26 = vadd.s32 32, %v316_v1  ;;  %vm101_vm1 = vcmp.eq.s32.totalorder %v37_v14, %v335_v12  ;;  %v117_v29 = vsub.f32 1.0, %v19_v18  ;;  %v418_v34 = vld [vmem:[%s565_s0 + $0x18] sm:$0xff]  ;;  %v21_v39 = vld [vmem:[%s566_s1 + $0x20] sm:$0xff] }
   0xc   :  { %v123_v24 = vsel %vm365_vm9, %v115_v13, %v17_v3  ;;  %vm68_vm11 = vmor %vm48_vm5, %vm60_vm6  ;;  %v139_v31 = vmax.f32 %v352_v16, %v374_v22  ;;  %v140_v32 = vmax.f32 %v359_v17, %v379_v23  ;;  %vm50_vm3 = vcmp.eq.s32.totalorder %v38_v21, %v329_v9  ;;  %v425_v35 = vld [vmem:[%s565_s0 + $0x38] sm:$0xff]  ;;  %v22_v46 = vld [vmem:[%s566_s1 + $0x28] sm:$0xff] }
   0xd   :  { %131 = vst [vmem:[#allocation2] sm:$0xff] %v123_v24  ;;  %vm88_vm14 = vmor %vm68_vm11, %vm80_vm8  ;;  %vm62_vm4 = vcmp.eq.s32.totalorder %v38_v21, %v331_v10  ;;  %vm82_vm6 = vcmp.eq.s32.totalorder %v38_v21, %v333_v11  ;;  %v141_v36 = vmax.f32 %v388_v25, %v395_v27  ;;  %vm102_vm8 = vcmp.eq.s32.totalorder %v38_v21, %v335_v12  ;;  %v23_v53 = vld [vmem:[%s566_s1 + $0x30] sm:$0xff]  ;;  %v24_v59 = vld [vmem:[%s566_s1 + $0x38] sm:$0xff]  ;;  %s287_s1 = smov [#allocation2]  }
   0xe   :  { %vm399_vm0 = vmor %vm88_vm14, %vm100_vm10  ;;  %v118_v38 = vsub.f32 1.0, %v20_v30  ;;  %vm51_vm10 = vcmp.eq.s32.totalorder %v39_v26, %v329_v9  ;;  %v40_v40 = vadd.s32 40, %v316_v1  ;;  %v143_v42 = vmax.f32 %v139_v31, %v140_v32  ;;  %s227_s20 = sshll.u32 %s287_s1, 4  ;;  %s228_s20 = int_to_ptr.vmem [resolvable:$true] %s227_s20 }
   0xf   :  { %v124_v33 = vsel %vm399_vm0, %v116_v20, %v18_v15  ;;  %vm69_vm2 = vmor %vm49_vm12, %vm61_vm13  ;;  %vm63_vm12 = vcmp.eq.s32.totalorder %v39_v26, %v331_v10  ;;  %v142_v43 = vmax.f32 %v418_v34, %v425_v35  ;;  %vm83_vm14 = vcmp.eq.s32.totalorder %v39_v26, %v333_v11  ;;  %s263_s21 = scalar_lea.vmem %s228_s20, 1024  ;;  %p268_p1 = scmp.lt.s32.totalorder %s228_s20, %s228_s20 }
  0x10   :  { %132 = vst [vmem:[#allocation2 + $0x8] sm:$0xff] %v124_v33  ;;  %vm89_vm5 = vmor %vm69_vm2, %vm81_vm15  ;;  %v119_v45 = vsub.f32 1.0, %v21_v39  ;;  %v41_v47 = vadd.s32 48, %v316_v1  ;;  %v579_v51 = vmov 0  ;;  %v120_v52 = vsub.f32 1.0, %v22_v46  ;;  %p264_p0 = scmp.ne.s32.totalorder %s228_s20, %s263_s21  ;;  %p269_p2 = scmp.lt.s32.totalorder %s263_s21, %s263_s21 }
  0x11   :  { %vm434_vm7 = vmor %vm89_vm5, %vm101_vm1  ;;  %vm103_vm1 = vcmp.eq.s32.totalorder %v39_v26, %v335_v12  ;;  %v144_v48 = vmax.f32 %v141_v36, %v142_v43  ;;  %v42_v54 = vadd.s32 56, %v316_v1  ;;  %v121_v58 = vsub.f32 1.0, %v23_v53 }
  0x12   :  { %v125_v41 = vsel %vm434_vm7, %v117_v29, %v19_v18  ;;  %vm70_vm11 = vmor %vm50_vm3, %vm62_vm4  ;;  %vm52_vm3 = vcmp.eq.s32.totalorder %v40_v40, %v329_v9  ;;  %vm64_vm4 = vcmp.eq.s32.totalorder %v40_v40, %v331_v10  ;;  %v122_v1 = vsub.f32 1.0, %v24_v59  ;;  %p270_p3 = por %p269_p2, %p268_p1 }
  0x13   :  { %133 = vst [vmem:[#allocation2 + $0x10] sm:$0xff] %v125_v41  ;;  %vm90_vm13 = vmor %vm70_vm11, %vm82_vm6  ;;  %vm84_vm6 = vcmp.eq.s32.totalorder %v40_v40, %v333_v11  ;;  %v145_v50 = vmax.f32 %v143_v42, %v144_v48  ;;  %vm104_vm11 = vcmp.eq.s32.totalorder %v40_v40, %v335_v12 }
  0x14   :  { %vm450_vm15 = vmor %vm90_vm13, %vm102_vm8  ;;  %vm65_vm13 = vcmp.eq.s32.totalorder %v41_v47, %v331_v10  ;;  %p271_p4 = pnand %p270_p3, %p264_p0 }
  0x15   :  { %v126_v49 = vsel %vm450_vm15, %v118_v38, %v20_v30  ;;  %vm71_vm2 = vmor %vm51_vm10, %vm63_vm12  ;;  %vm53_vm12 = vcmp.eq.s32.totalorder %v41_v47, %v329_v9  ;;  %v146_v56 = vrot.slane %v145_v50, 4 }
  0x16   :  { %134 = vst [vmem:[#allocation2 + $0x18] sm:$0xff] %v126_v49  ;;  %vm91_vm5 = vmor %vm71_vm2, %vm83_vm14 }
  0x17   :  { %vm466_vm8 = vmor %vm91_vm5, %vm103_vm1  ;;  %vm85_vm1 = vcmp.eq.s32.totalorder %v41_v47, %v333_v11  ;;  %vm105_vm5 = vcmp.eq.s32.totalorder %v41_v47, %v335_v12  ;;  %v147_v60 = vmax.f32 %v145_v50, %v146_v56 }
  0x18   :  { %v580_v51 = vsel %vm466_vm8, 4294967295, %v579_v51  ;;  %v127_v55 = vsel %vm466_vm8, %v119_v45, %v21_v39  ;;  %vm72_vm10 = vmor %vm52_vm3, %vm64_vm4  ;;  %vm54_vm4 = vcmp.eq.s32.totalorder %v42_v54, %v329_v9  ;;  %vm106_vm8 = vcmp.eq.s32.totalorder %v42_v54, %v335_v12 }
  0x19   :  { %135 = vst [vmem:[#allocation2 + $0x20] sm:$0xff] %v127_v55  ;;  %vm92_vm14 = vmor %vm72_vm10, %vm84_vm6  ;;  %vm66_vm6 = vcmp.eq.s32.totalorder %v42_v54, %v331_v10  ;;  %vm86_vm10 = vcmp.eq.s32.totalorder %v42_v54, %v333_v11  ;;  %v148_v62 = vrot.slane %v147_v60, 2 }
  0x1a   :  { %vm480_vm2 = vmor %vm92_vm14, %vm104_vm11 }
  0x1b   :  { %v128_v61 = vsel %vm480_vm2, %v120_v52, %v22_v46  ;;  %vm73_vm3 = vmor %vm53_vm12, %vm65_vm13  ;;  %v149_v3 = vmax.f32 %v147_v60, %v148_v62 }
  0x1c   :  { %136 = vst [vmem:[#allocation2 + $0x28] sm:$0xff] %v128_v61  ;;  %vm93_vm11 = vmor %vm73_vm3, %vm85_vm1 }
  0x1d   :  { %vm493_vm14 = vmor %vm93_vm11, %vm105_vm5  ;;  %v150_v5 = vrot.slane %v149_v3, 1 }
  0x1e   :  { %v129_v2 = vsel %vm493_vm14, %v121_v58, %v23_v53  ;;  %vm74_vm12 = vmor %vm54_vm4, %vm66_vm6 }
  0x1f   :  { %137 = vst [vmem:[#allocation2 + $0x30] sm:$0xff] %v129_v2  ;;  %vm94_vm13 = vmor %vm74_vm12, %vm86_vm10  ;;  %v506_v7 = vmax.f32 %v149_v3, %v150_v5 }
  0x20   :  { %vm500_vm1 = vmor %vm94_vm13, %vm106_vm8 }
  0x21   :  { %v130_v6 = vsel %vm500_vm1, %v122_v1, %v24_v59 }
  0x22   :  { %138 = vst [vmem:[#allocation2 + $0x38] sm:$0xff] %v130_v6 }
  0x23   :  { %274 = shalt.err (!%p271_p4)
}
  0x24   :  { %s275_s24 = scalar_lea.hbm %s568_s3, 1024 }
  0x25   :  { %p276_p5 = scmp.ne.s32.totalorder %s568_s3, %s275_s24  ;;  %p279_p6 = scmp.lt.u32.totalorder %s275_s24, %s568_s3 }
  0x27   :  { %p281_p7 = pnand %p279_p6, %p276_p5 }
  0x29   :  { %284 = shalt.err (!%p281_p7)
}
  0x2a   :  { %s288_s29 = smov 128   ;;  %s289_s30 = smov 8   ;;  %v152_v8 = vsub.f32 %v352_v16, %v506_v7  ;;  %v153_v9 = vsub.f32 %v359_v17, %v506_v7  ;;  %v154_v10 = vsub.f32 %v388_v25, %v506_v7  ;;  %v155_v11 = vsub.f32 %v418_v34, %v506_v7 }
  0x2b   :  { %233 = dma.vmem_to_hbm [thread:$0]  %s228_s20, 1024, %s568_s3, [#allocation3], %s288_s29, %s288_s29, %s289_s30   ;;  %v156_v12 = vsub.f32 %v374_v22, %v506_v7  ;;  %v192_v14 = vsel %vm365_vm9, %v352_v16, 0.0  ;;  %v193_v15 = vsel %vm399_vm0, %v359_v17, 0.0  ;;  %v157_v21 = vsub.f32 %v379_v23, %v506_v7 }
  0x2c   :  { %v160_v13 = vmul.f32 1.442695, %v152_v8  ;;  %v162_v18 = vmul.f32 1.442695, %v153_v9  ;;  %v164_v20 = vmul.f32 1.442695, %v154_v10  ;;  %v200_v26 = vadd.f32 %v193_v15, %v192_v14 }
  0x2d   :  { %v166_v24 = vmul.f32 1.442695, %v155_v11  ;;  %v158_v29 = vsub.f32 %v395_v27, %v506_v7  ;;  %v168_v30 = vmul.f32 1.442695, %v156_v12  ;;  %v194_v16 = vsel %vm434_vm7, %v388_v25, 0.0 }
  0x2e   :  { %245 = vpow2.f32 %v160_v13  ;;  %v159_v17 = vsub.f32 %v425_v35, %v506_v7  ;;  %v170_v19 = vmul.f32 1.442695, %v157_v21  ;;  %v201_v28 = vadd.f32 %v200_v26, %v194_v16 }
  0x2f   :  { %247 = vpow2.f32 %v162_v18  ;;  %v172_v31 = vmul.f32 1.442695, %v158_v29  ;;  %v195_v32 = vsel %vm450_vm15, %v418_v34, 0.0  ;;  %vm587_vm9 = vnez %v580_v51 }
  0x30   :  { %249 = vpow2.f32 %v164_v20  ;;  %v174_v33 = vmul.f32 1.442695, %v159_v17  ;;  %v202_v36 = vadd.f32 %v201_v28, %v195_v32  ;;  %v196_v25 = vsel %vm587_vm9, %v374_v22, 0.0 }
  0x31   :  { %251 = vpow2.f32 %v166_v24  ;;  %v197_v43 = vsel %vm480_vm2, %v379_v23, 0.0  ;;  %v198_v48 = vsel %vm493_vm14, %v395_v27, 0.0  ;;  %v199_v53 = vsel %vm500_vm1, %v425_v35, 0.0 }
  0x32   :  { %253 = vpow2.f32 %v168_v30  ;;  %v203_v42 = vadd.f32 %v202_v36, %v196_v25  ;;  %v215_v5 = vand.u32 127, %v34_v0 }
  0x33   :  { %255 = vpow2.f32 %v170_v19 }
  0x34   :  { %257 = vpow2.f32 %v172_v31  ;;  %v204_v47 = vadd.f32 %v203_v42, %v197_v43  ;;  %vm218_vm0 = vcmp.lt.s32.totalorder %v215_v5, 64 }
  0x35   :  { %259 = vpow2.f32 %v174_v33 }
  0x36   :  { %v205_v52 = vadd.f32 %v204_v47, %v198_v48 }
  0x38   :  { %v246_v38 = vpop.eup %245  ;;  %v206_v55 = vadd.f32 %v205_v52, %v199_v53 }
  0x39   :  { %v248_v37 = vpop.eup %247 }
  0x3a   :  { %v250_v39 = vpop.eup %249  ;;  %v176_v40 = vadd.f32 %v248_v37, %v246_v38  ;;  %v207_v58 = vrot.slane %v206_v55, 4 }
  0x3b   :  { %v252_v41 = vpop.eup %251 }
  0x3c   :  { %v177_v34 = vadd.f32 %v250_v39, %v176_v40  ;;  %v254_v44 = vpop.eup %253  ;;  %v208_v61 = vadd.f32 %v207_v58, %v206_v55 }
  0x3d   :  { %v256_v46 = vpop.eup %255 }
  0x3e   :  { %v178_v45 = vadd.f32 %v252_v41, %v177_v34  ;;  %v258_v49 = vpop.eup %257  ;;  %v209_v63 = vrot.slane %v208_v61, 2 }
  0x3f   :  { %v260_v51 = vpop.eup %259 }
  0x40   :  { %v179_v22 = vadd.f32 %v254_v44, %v178_v45  ;;  %v210_v1 = vadd.f32 %v209_v63, %v208_v61 }
  0x42   :  { %v180_v50 = vadd.f32 %v256_v46, %v179_v22  ;;  %v211_v2 = vrot.slane %v210_v1, 1 }
  0x44   :  { %v181_v54 = vadd.f32 %v258_v49, %v180_v50  ;;  %v212_v35 = vadd.f32 %v211_v2, %v210_v1 }
  0x46   :  { %v182_v23 = vadd.f32 %v260_v51, %v181_v54 }
  0x48   :  { %v183_v56 = vrot.slane %v182_v23, 4 }
  0x4a   :  { %v184_v57 = vadd.f32 %v183_v56, %v182_v23 }
  0x4c   :  { %v185_v59 = vrot.slane %v184_v57, 2 }
  0x4e   :  { %v186_v60 = vadd.f32 %v185_v59, %v184_v57 }
  0x50   :  { %v187_v62 = vrot.slane %v186_v60, 1 }
  0x52   :  { %v188_v27 = vadd.f32 %v187_v62, %v186_v60 }
  0x54   :  { %261 = vlog2.f32 %v188_v27 }
  0x5e   :  { %v262_v3 = vpop.eup %261 }
  0x5f   :  { %v190_v4 = vmul.f32 0.6931472, %v262_v3 }
  0x61   :  { %v191_v6 = vadd.f32 %v190_v4, %v506_v7 }
  0x63   :  { %v219_v8 = vsub.f32 %v212_v35, %v191_v6 }
  0x65   :  { %v220_v9 = vsel %vm218_vm0, %v219_v8, 0.0 }
  0x66   :  { %221 = vst [vmem:[%s569_s4] sm:$0x1] %v220_v9 }
  0x67   :  { %285 = dma.done.wait [#allocation3], 1024  }
  0x68   :  { %286 = vsyncadd [#allocation3], 4294966272 }
  0x69   :  { %241 = vsyncpa [#allocation3], 1 }

</bundles_post_ra>
